<compile_context>
chip_gen: v6e
topology: v6e:2x2x1
jax: 0.10.0
libtpu: 0.0.40
codegen_flags: <defaults>
</compile_context>

<pallas_src>
import jax
import jax.numpy as jnp
from jax.experimental import pallas as pl
from jax.experimental.pallas import tpu as pltpu


def _round_up(x, m):
    return (x + m - 1) // m * m


# ----------------------------- Pallas kernel ------------------------------ #
def _patch_embed_kernel(x_ref, w_ref, pos_ref, o_ref):
    # x_ref:   (1, TM, Kp)  patchified pixel rows for one image / one row tile
    # w_ref:   (Kp, Dp)     conv weight as matmul weight (resident in VMEM)
    # pos_ref: (TM, Dp)     position embedding rows + conv bias (pre-folded)
    # o_ref:   (1, TM, Dp)
    acc = jnp.dot(x_ref[0], w_ref[...], preferred_element_type=jnp.float32)
    o_ref[0] = (acc + pos_ref[...].astype(jnp.float32)).astype(o_ref.dtype)


def _patch_embed_matmul(x, w, pos, *, tile_m):
    """out[b, r, :] = x[b, r, :] @ w + pos[r, :]  (pos already includes the bias)."""
    B, HW_pad, K_pad = x.shape
    D_pad = w.shape[1]
    assert HW_pad % tile_m == 0
    n_tiles = HW_pad // tile_m
    dtype = x.dtype
    itemsize = jnp.dtype(dtype).itemsize

    # VMEM budget: double-buffered X / pos / out tiles + (up to) double-buffered
    # resident weight block.  Cap at 64 MiB so it is also legal on v7x.
    vmem_need = (2 * tile_m * (K_pad + 2 * D_pad) + 2 * K_pad * D_pad) * itemsize
    vmem_limit = int(min(64 * 1024 * 1024,
                         max(vmem_need + vmem_need // 2 + (1 << 20),
                             8 * 1024 * 1024)))

    return pl.pallas_call(
        _patch_embed_kernel,
        out_shape=jax.ShapeDtypeStruct((B, HW_pad, D_pad), dtype),
        grid_spec=pltpu.PrefetchScalarGridSpec(
            num_scalar_prefetch=0,
            # Batch axis innermost: the pos tile's block index only changes when
            # j changes, so each pos tile is fetched once, not B times.
            grid=(n_tiles, B),
            in_specs=[
                pl.BlockSpec((1, tile_m, K_pad), lambda j, b: (b, j, 0)),
                # Constant block index -> weight stays resident, no refetch.
                pl.BlockSpec((K_pad, D_pad), lambda j, b: (0, 0)),
                # Shared across batch -> no B-times broadcast materialized in HBM.
                pl.BlockSpec((tile_m, D_pad), lambda j, b: (j, 0)),
            ],
            out_specs=pl.BlockSpec((1, tile_m, D_pad), lambda j, b: (b, j, 0)),
        ),
        compiler_params=pltpu.CompilerParams(
            dimension_semantics=("parallel", "parallel"),
            vmem_limit_bytes=vmem_limit),
    )(x, w, pos)


# ------------------------------ Model wrapper ------------------------------ #
class InternVisionEmbeddingsPallas:
    """JAX/Pallas port of lmdeploy InternVisionEmbeddings (mono vision)."""

    def __init__(self, hidden_size, image_size, patch_size, dtype=jnp.float32, key=None):
        self.embed_dim = hidden_size
        self.image_size = image_size
        self.patch_size = patch_size
        self.num_patches = (image_size // patch_size) ** 2
        self.num_positions = self.num_patches + 1
        self.dtype = dtype

        if key is None:
            key = jax.random.PRNGKey(0)
        k_cls, k_w, k_b, k_pos = jax.random.split(key, 4)
        # class_embedding: (1, 1, D)
        self.class_embedding = 0.02 * jax.random.normal(k_cls, (1, 1, hidden_size), dtype)
        # Conv2d(3, D, kernel_size=P, stride=P): weight (D, 3, P, P), bias (D,)
        self.conv_weight = 0.02 * jax.random.normal(
            k_w, (hidden_size, 3, patch_size, patch_size), dtype)
        self.conv_bias = 0.02 * jax.random.normal(k_b, (hidden_size,), dtype)
        # position_embedding: (1, num_positions, D)
        self.position_embedding = 0.02 * jax.random.normal(
            k_pos, (1, self.num_positions, hidden_size), dtype)

    def _get_pos_embed(self, pos_embed, H, W):
        # pos_embed: (num_patches, D) -> resized to (H*W, D)
        side = self.image_size // self.patch_size
        if H == side and W == side:
            # Same-size bicubic (align_corners=False) is an exact identity.
            return pos_embed
        # TODO(synk): jax.image.resize bicubic uses a Keys kernel (a=-0.5) vs
        # PyTorch bicubic (a=-0.75); values differ slightly when resizing.
        grid = pos_embed.astype(jnp.float32).reshape(side, side, self.embed_dim)
        grid = jax.image.resize(grid, (H, W, self.embed_dim), method="bicubic")
        return grid.reshape(H * W, self.embed_dim).astype(pos_embed.dtype)

    def __call__(self, pixel_values, compute_dtype=None):
        if pixel_values.ndim != 4:
            raise ValueError(f"wrong pixel_values size: {pixel_values.shape}")
        cdtype = self.dtype if compute_dtype is None else compute_dtype
        B, C, Himg, Wimg = pixel_values.shape
        P, D = self.patch_size, self.embed_dim
        H, W = Himg // P, Wimg // P
        HW = H * W
        K = C * P * P

        # Alignment / tiling (K, D lane-aligned; rows padded to the tile).
        K_pad = _round_up(K, 128)
        D_pad = _round_up(D, 128)
        tile_m = 256 if HW >= 256 else _round_up(HW, 8)   # sweep 256/512 at real sizes
        HW_pad = _round_up(HW, tile_m)

        # --- glue: patchify NCHW -> (B, HW_pad, K_pad), row-major over (h, w) ---
        x = pixel_values.astype(cdtype)
        x = x.reshape(B, C, H, P, W, P)
        x = jnp.transpose(x, (0, 2, 4, 1, 3, 5))            # (B, H, W, C, P, P)
        x = x.reshape(B, HW, K)
        x = jnp.pad(x, ((0, 0), (0, HW_pad - HW), (0, K_pad - K)))

        # --- glue: conv weight -> (K_pad, D_pad) matmul weight ---
        w_mat = self.conv_weight.astype(cdtype).reshape(D, K).T     # (K, D)
        w_mat = jnp.pad(w_mat, ((0, K_pad - K), (0, D_pad - D)))

        # --- glue: pos-embed for patch tokens, bias folded in (f32 math) ---
        pos_patch = self._get_pos_embed(
            self.position_embedding[0, 1:, :].astype(jnp.float32), H, W)  # (HW, D)
        pos_bias = pos_patch + self.conv_bias.astype(jnp.float32)[None, :]
        pos_bias = jnp.pad(pos_bias, ((0, HW_pad - HW), (0, D_pad - D))).astype(cdtype)

        # --- hot path in Pallas: matmul + (bias + pos) add ---
        out = _patch_embed_matmul(x, w_mat, pos_bias, tile_m=tile_m)  # (B, HW_pad, D_pad)
        patch_tokens = out[:, :HW, :D]

        # --- class token row: class_embedding + position_embedding[:, 0] ---
        cls = (self.class_embedding[0, 0].astype(jnp.float32)
               + self.position_embedding[0, 0].astype(jnp.float32)).astype(cdtype)
        cls = jnp.broadcast_to(cls[None, None, :], (B, 1, D))

        return jnp.concatenate([cls, patch_tokens], axis=1)          # (B, HW+1, D)


# ------------------------------ reference ---------------------------------- #
def _reference_forward(model, pixel_values):
    """Pure-JAX reference using lax.conv_general_dilated (matches PyTorch Conv2d)."""
    P, D = model.patch_size, model.embed_dim
    out = jax.lax.conv_general_dilated(
        pixel_values.astype(jnp.float32),
        model.conv_weight.astype(jnp.float32),
        window_strides=(P, P),
        padding="VALID",
        dimension_numbers=("NCHW", "OIHW", "NCHW"),
    )
    out = out + model.conv_bias.astype(jnp.float32).reshape(1, D, 1, 1)
    B, _, H, W = out.shape
    patch_embeds = out.reshape(B, D, H * W).transpose(0, 2, 1)              # (B, HW, D)
    pos = model._get_pos_embed(
        model.position_embedding[0, 1:, :].astype(jnp.float32), H, W)      # (HW, D)
    patch_embeds = patch_embeds + pos[None]
    cls = (model.class_embedding[0, 0].astype(jnp.float32)
           + model.position_embedding[0, 0].astype(jnp.float32))
    cls = jnp.broadcast_to(cls[None, None, :], (B, 1, D))
    return jnp.concatenate([cls, patch_embeds], axis=1)                     # (B, HW+1, D)


if __name__ == "__main__":
    # Small config: hidden_size=32, image_size=16, patch_size=4 -> 16 patches + cls token.
    hidden_size, image_size, patch_size = 32, 16, 4
    batch = 2

    key = jax.random.PRNGKey(0)
    k_model, k_pix = jax.random.split(key)
    model = InternVisionEmbeddingsPallas(hidden_size, image_size, patch_size,
                                         dtype=jnp.float32, key=k_model)

    pixel_values = jax.random.normal(k_pix, (batch, 3, image_size, image_size), jnp.float32)

    out = jax.block_until_ready(model(pixel_values))
    ref = jax.block_until_ready(_reference_forward(model, pixel_values))

    num_tokens = (image_size // patch_size) ** 2 + 1
    assert out.shape == (batch, num_tokens, hidden_size), out.shape
    assert jnp.allclose(out, ref, atol=1e-5, rtol=1e-5), float(jnp.abs(out - ref).max())

    # bf16 compute path (halves HBM traffic of this memory-bound op; f32 MXU accumulation).
    out_bf16 = jax.block_until_ready(model(pixel_values, compute_dtype=jnp.bfloat16))
    assert out_bf16.shape == (batch, num_tokens, hidden_size), out_bf16.shape
    assert jnp.allclose(out_bf16.astype(jnp.float32), ref, atol=3e-2, rtol=3e-2), \
        float(jnp.abs(out_bf16.astype(jnp.float32) - ref).max())

    print("KERNEL_OK")
</pallas_src>

<mosaic_0001>
module attributes {stable_mosaic.version = 11 : i64} {
  func.func @_patch_embed_kernel(%arg0: i32, %arg1: i32, %arg2: memref<1x16x128xf32, #tpu.memory_space<vmem>>, %arg3: memref<128x128xf32, #tpu.memory_space<vmem>>, %arg4: memref<16x128xf32, #tpu.memory_space<vmem>>, %arg5: memref<1x16x128xf32, #tpu.memory_space<vmem>>) attributes {dimension_semantics = [#tpu.dimension_semantics<parallel>, #tpu.dimension_semantics<parallel>], iteration_bounds = array<i64: 1, 2>, scalar_prefetch = 0 : i64, scratch_operands = 0 : i64, tpu.core_type = #tpu.core_type<tc>, window_params = [{transform_indices = @transform_0, window_bounds = array<i64: 1, 16, 128>}, {pipeline_mode = #tpu.pipeline_mode<synchronous>, transform_indices = @transform_1, window_bounds = array<i64: 128, 128>}, {transform_indices = @transform_2, window_bounds = array<i64: 16, 128>}, {transform_indices = @transform_3, window_bounds = array<i64: 1, 16, 128>}]} {
    %c0 = arith.constant 0 : index
    %c0_0 = arith.constant 0 : index
    %c0_1 = arith.constant 0 : index
    %0 = vector.load %arg2[%c0, %c0_0, %c0_1] : memref<1x16x128xf32, #tpu.memory_space<vmem>>, vector<1x16x128xf32>
    %1 = vector.shape_cast %0 : vector<1x16x128xf32> to vector<16x128xf32>
    %c0_2 = arith.constant 0 : index
    %c0_3 = arith.constant 0 : index
    %2 = vector.load %arg3[%c0_2, %c0_3] : memref<128x128xf32, #tpu.memory_space<vmem>>, vector<128x128xf32>
    %cst = arith.constant dense<0.000000e+00> : vector<16x128xf32>
    %3 = tpu.matmul %1, %2, %cst {dimension_numbers = #tpu.dot_dimension_numbers<[1], [0], [0], [1], [0, 0, 1, 1], [], []>} : vector<16x128xf32>, vector<128x128xf32>, vector<16x128xf32> -> vector<16x128xf32>
    %c0_4 = arith.constant 0 : index
    %c0_5 = arith.constant 0 : index
    %4 = vector.load %arg4[%c0_4, %c0_5] : memref<16x128xf32, #tpu.memory_space<vmem>>, vector<16x128xf32>
    %5 = arith.addf %3, %4 : vector<16x128xf32>
    %c0_6 = arith.constant 0 : index
    %c0_7 = arith.constant 0 : index
    %c0_8 = arith.constant 0 : index
    %6 = vector.load %arg5[%c0_6, %c0_7, %c0_8] : memref<1x16x128xf32, #tpu.memory_space<vmem>>, vector<1x16x128xf32>
    %7 = vector.shape_cast %6 : vector<1x16x128xf32> to vector<16x128xf32>
    %8 = vector.shape_cast %5 : vector<16x128xf32> to vector<1x16x128xf32>
    tpu.vector_store %arg5[%c0_6, %c0_7, %c0_8], %8 {strides = array<i32>} : memref<1x16x128xf32, #tpu.memory_space<vmem>>, vector<1x16x128xf32>,
    return
  }
  func.func @transform_0(%arg0: i32, %arg1: i32) -> (i32, i32, i32) {
    %c0_i32 = arith.constant 0 : i32
    %c0_i32_0 = arith.constant 0 : i32
    return %arg1, %arg0, %c0_i32 : i32, i32, i32
  }
  func.func @transform_1(%arg0: i32, %arg1: i32) -> (i32, i32) {
    %c0_i32 = arith.constant 0 : i32
    %c0_i32_0 = arith.constant 0 : i32
    %c0_i32_1 = arith.constant 0 : i32
    return %c0_i32, %c0_i32_0 : i32, i32
  }
  func.func @transform_2(%arg0: i32, %arg1: i32) -> (i32, i32) {
    %c0_i32 = arith.constant 0 : i32
    %c0_i32_0 = arith.constant 0 : i32
    return %arg0, %c0_i32 : i32, i32
  }
  func.func @transform_3(%arg0: i32, %arg1: i32) -> (i32, i32, i32) {
    %c0_i32 = arith.constant 0 : i32
    %c0_i32_0 = arith.constant 0 : i32
    return %arg1, %arg0, %c0_i32 : i32, i32, i32
  }
}

</mosaic_0001>

<bundles_post_ra>
// kernel: tpu_custom_call.1
= control target key start
LH: loop header
LB: loop body
LE: loop exit
PB: predicated region body
PF: predicated region fallthrough
CT: control target
= control target key end

     0   :  { %8 = vsyncpa [#allocation3], 0  ;;  %s1028_s0 = inlined_call_operand.hbm [shape: f32[2,16,128], index: 0, kind: input, shape index: {}]   ;;  %s1029_s1 = inlined_call_operand.hbm [shape: f32[128,128], index: 1, kind: input, shape index: {}]   ;;  %s1030_s2 = inlined_call_operand.hbm [shape: f32[16,128], index: 2, kind: input, shape index: {}]   ;;  %s1031_s3 = inlined_call_operand.hbm [shape: f32[2,16,128], index: 3, kind: output, shape index: {}]  }
   0x1   :  { %10 = vsyncpa [#allocation3 + $0x1], 0 }
   0x2   :  { %11 = vsyncpa [#allocation6], 0 }
   0x3   :  { %12 = vsyncpa [#allocation4], 0 }
   0x4   :  { %14 = vsyncpa [#allocation4 + $0x1], 0  ;;  %s823_s12 = smov 0   ;;  %s825_s13 = smov 0  }
   0x5   :  { %s827_s14 = smov 0   ;;  %s829_s15 = smov 0  }
   0x6   :  { %s831_s16 = smov 0   ;;  %s833_s17 = smov 0  }
   0x7 LB: > { %s468_s18 = sadd.s32 4294967295, %s793_s17   ;;  %s469_s19 = sadd.s32 4294967294, %s793_s17   ;;  %s793_s17 = sphi %s833_s17, %s20_s17   ;;  %s789_s16 = sphi %s831_s16, %s1048_s16   ;;  %s785_s15 = sphi %s829_s15, %s1047_s15   ;;  %s781_s14 = sphi %s827_s14, %s1046_s14   ;;  %s777_s13 = sphi %s825_s13, %s1045_s13   ;;  %s773_s12 = sphi %s823_s12, %s1044_s12  }
   0x8   : > { %p54_p0 = scmp.ne.s32.totalorder %s777_s13, %s773_s12  ;;  %p857_p1 = scmp.eq.s32.totalorder %s468_s18, 0 }
   0x9   : > { %p861_p2 = scmp.eq.s32.totalorder %s468_s18, 1  ;;  %p133_p3 = scmp.eq.s32.totalorder %s469_s19, 1 }
   0xa   : > { %p867_p4 = por %p857_p1, %p54_p0  ;;  %p470_p5 = scmp.ge.s32.totalorder %s793_s17, 1 }
   0xb   : > { %p872_p6 = por %p133_p3, %p54_p0  ;;  %p140_p7 = scmp.lt.s32.totalorder %s793_s17, 3 }
   0xc   : > { %s795_s25 = smov [#allocation5]   ;;  %s796_s28 = smov [#allocation7]  }
   0xd   : > { %s1036_s23 = scalar_select %p872_p6, 1, 0 }
   0xe   : > { %p877_p8 = pnand %p470_p5, %p140_p7  ;;  %s152_s26 = sshll.u32 %s795_s25, 4  ;;  %s153_s26 = int_to_ptr.vmem [resolvable:$true] %s152_s26 }
   0xf   : > { %s168_s29 = sshll.u32 %s796_s28, 4  ;;  %s640_s30 = scalar_lea.vmem %s153_s26, 2048  ;;  %s169_s29 = int_to_ptr.vmem [resolvable:$true] %s168_s29 }
  0x10   : > { %p554_p9 = pneg %p877_p8  ;;  %p641_p13 = scmp.ne.s32.totalorder %s153_s26, %s640_s30 }
  0x11   : > { %p648_p5 = scmp.lt.s32.totalorder %s153_s26, %s153_s26  ;;  %p649_p7 = scmp.lt.s32.totalorder %s640_s30, %s640_s30 }
  0x12   : > { %p886_p11 = pnand %p554_p9, %p857_p1 }
  0x13   : > { %p650_p10 = por %p649_p7, %p648_p5 }
  0x14   : > { %p631_p12 = pneg %p886_p11 }
  0x16   : > { %p643_p0 = pnand %p641_p13, %p631_p12 }
  0x18   : > { %p644_p3 = pneg %p643_p0 }
  0x1a   : > { %p651_p9 = pnand %p650_p10, %p644_p3 }
  0x1c   : > { %654 = shalt.err (!%p651_p9)
}
  0x1d   : > { %s1032_s4 = smov 128   ;;  %s798_s5 = smov 8  }
  0x1e   : > { %557 = dma.hbm_to_vmem [thread:$0]  (!%p886_p11), %s1029_s1, 2048, %s153_s26, [#allocation6], %s1032_s4, %s1032_s4, %s798_s5  }
  0x1f   : > { %s666_s8 = scalar_lea.vmem %s169_s29, 256  ;;  %p674_p10 = scmp.lt.s32.totalorder %s169_s29, %s169_s29 }
  0x20   : > { %p667_p13 = scmp.ne.s32.totalorder %s169_s29, %s666_s8  ;;  %p675_p3 = scmp.lt.s32.totalorder %s666_s8, %s666_s8 }
  0x22   : > { %p669_p0 = pnand %p667_p13, %p631_p12  ;;  %p676_p7 = por %p675_p3, %p674_p10 }
  0x24   : > { %p670_p5 = pneg %p669_p0 }
  0x26   : > { %p677_p9 = pnand %p676_p7, %p670_p5 }
  0x28   : > { %680 = shalt.err (!%p677_p9)
}
  0x29   : > { %560 = dma.hbm_to_vmem [thread:$0]  (!%p886_p11), %s1030_s2, 256, %s169_s29, [#allocation6], %s1032_s4, %s1032_s4, %s798_s5  }
  0x2a   : > { %s29_s11 = sadd.s32 1, %s789_s16  ;;  %s41_s18 = sadd.s32 1, %s781_s14 }
  0x2b   : > { %p30_p12 = scmp.ge.s32.totalorder %s29_s11, 2  ;;  %p48_p13 = scmp.ne.s32.totalorder %s781_s14, %s777_s13 }
  0x2c   : > { %p49_p0 = scmp.eq.s32.totalorder %s793_s17, 0  ;;  %p571_p5 = scmp.lt.s32.totalorder %s793_s17, 2 }
  0x2d   : > { %s1050_s11 = smov (%p30_p12, %s29_s11), 0  ;;  %p924_p3 = por %p861_p2, %p48_p13 }
  0x2e   : > { %p50_p10 = por %p49_p0, %p48_p13  ;;  %s36_s25 = ssub.s32 %s789_s16, %s1050_s11 }
  0x2f   : > { %s182_s26 = sand.u32 1, %s781_s14   ;;  %p39_p7 = scmp.eq.s32.totalorder %s36_s25, 0 }
  0x30   : > { %s474_s27 = sshll.u32 %s182_s26, 4  ;;  %s487_s28 = sshll.u32 %s789_s16, 8 }
  0x31   : > { %s933_s29 = scalar_select %p39_p7, %s781_s14, %s41_s18  }
  0x32   : > { %s194_s7 = scalar_lea.hbm %s1028_s0, %s487_s28  ;;  %s186_s8 = scalar_lea.vmem [#allocation2], %s474_s27 }
  0x33   : > { %s195_s9 = sshll.u32 %s186_s8, 4  ;;  %p940_p11 = pnand %p571_p5, %p50_p10  ;;  %s196_s9 = int_to_ptr.vmem [resolvable:$true] %s195_s9 }
  0x34   : > { %s183_s10 = scalar_lea.sflag [#allocation3], %s182_s26  ;;  %s694_s25 = scalar_lea.vmem %s196_s9, 256 }
  0x35   : > { %p683_p2 = pneg %p940_p11  ;;  %p695_p9 = scmp.ne.s32.totalorder %s196_s9, %s694_s25 }
  0x36   : > { %s799_s18 = smov [#allocation2]  }
  0x37   : > { %p697_p12 = pnand %p695_p9, %p683_p2  ;;  %s699_s4 = sshll.u32 %s799_s18, 4  ;;  %s700_s4 = int_to_ptr.vmem [resolvable:$false] %s699_s4 }
  0x38   : > { %s701_s28 = scalar_lea.vmem %s700_s4, 512  ;;  %p702_p0 = scmp.lt.s32.totalorder %s196_s9, %s700_s4 }
  0x39   : > { %p698_p13 = pneg %p697_p12  ;;  %p703_p7 = scmp.lt.s32.totalorder %s701_s28, %s694_s25 }
  0x3b   : > { %p704_p6 = por %p703_p7, %p702_p0 }
  0x3d   : > { %p705_p5 = pnand %p704_p6, %p698_p13 }
  0x3f   : > { %708 = shalt.err (!%p705_p5)
}
  0x40   : > { %s1041_s27 = smov 128   ;;  %207 = sbr.rel (%p877_p8) target bundleno = 316 (0x13c), region = 32 }
  0x41   : > { %564 = dma.hbm_to_vmem [thread:$0]  (!%p940_p11), %s194_s7, 256, %s196_s9, %s183_s10, %s1041_s27, %s1041_s27, %s798_s5  }
  0x42   : > { %s954_s26 = sand.u32 (!%p877_p8), 1, %s777_s13  }
  0x43   : > { %s478_s4 = sshll.u32 (!%p877_p8), %s954_s26, 4  ;;  %s210_s30 = scalar_lea.sflag (!%p877_p8), [#allocation3], %s954_s26 }
  0x44   : > { %s960_s6 = scalar_lea.vmem (!%p877_p8), [#allocation2], %s478_s4 }
  0x45   : > { %760 = dma.done.wait (%p867_p4), %s210_s30, 256  }
  0x46   : > { %762 = vsyncadd (%p867_p4), %s210_s30, 4294967040 }
  0x47   : > { %764 = dma.done.wait (%p857_p1), [#allocation6], 2304  }
  0x48   : > { %766 = vsyncadd (%p857_p1), [#allocation6], 4294964992  ;;  %v264_v0 = vld [vmem:[#allocation5 + $0x78] sm:$0xff]  ;;  %v263_v1 = vld [vmem:[#allocation5 + $0x70] sm:$0xff]  ;;  %s243_s20 = scalar_lea.vmem [#allocation8], %s478_s4  ;;  %s488_s24 = sshll.u32 %s785_s15, 8 }
  0x49   : > { %507 = vmatprep.subr.mxu0 %v264_v0  ;;  %v262_v2 = vld [vmem:[#allocation5 + $0x68] sm:$0xff]  ;;  %v261_v3 = vld [vmem:[#allocation5 + $0x60] sm:$0xff]  ;;  %v260_v5 = vld [vmem:[#allocation5 + $0x58] sm:$0xff]  ;;  %s360_s22 = sshll.u32 %s243_s20, 4  ;;  %s980_s8 = scalar_lea.hbm %s1031_s3, %s488_s24  ;;  %s975_s22 = int_to_ptr.vmem [resolvable:$true] %s360_s22 }
  0x4a   : > { %508 = vmatpush3.msra.mxu0 %v264_v0  ;;  %v247_v4 = vld [vmem:[%s960_s6] sm:$0xff]  ;;  %v258_v7 = vld [vmem:[#allocation5 + $0x48] sm:$0xff]  ;;  %v256_v9 = vld [vmem:[#allocation5 + $0x38] sm:$0xff]  ;;  %s345_s9 = scalar_lea.sflag [#allocation4], %s954_s26  ;;  %s709_s21 = scalar_lea.vmem %s975_s22, 256 }
  0x4b   : > { %509 = vmatprep.subr.mxu0 %v263_v1  ;;  %539 = vmatprep.mubr.f32.mxu0 %v247_v4  ;;  %v259_v6 = vld [vmem:[#allocation5 + $0x50] sm:$0xff]  ;;  %v257_v8 = vld [vmem:[#allocation5 + $0x40] sm:$0xff]  ;;  %v254_v11 = vld [vmem:[#allocation5 + $0x28] sm:$0xff]  ;;  %p710_p1 = scmp.ne.s32.totalorder %s975_s22, %s709_s21  ;;  %s800_s15 = smov [#allocation8]  }
  0x4c   : > { %510 = vmatpush3.msra.mxu0 %v263_v1  ;;  %v255_v10 = vld [vmem:[#allocation5 + $0x30] sm:$0xff]  ;;  %v253_v12 = vld [vmem:[#allocation5 + $0x20] sm:$0xff]  ;;  %v252_v13 = vld [vmem:[#allocation5 + $0x18] sm:$0xff]  ;;  %s713_s10 = sshll.u32 %s800_s15, 4  ;;  %s714_s10 = int_to_ptr.vmem [resolvable:$false] %s713_s10 }
  0x4d   : > { %511 = vmatprep.subr.mxu0 %v262_v2  ;;  %v251_v14 = vld [vmem:[#allocation5 + $0x10] sm:$0xff]  ;;  %v250_v15 = vld [vmem:[#allocation5 + $0x8] sm:$0xff]  ;;  %v249_v16 = vld [vmem:[#allocation5] sm:$0xff]  ;;  %p711_p4 = pnand %p710_p1, %p924_p3  ;;  %s715_s25 = scalar_lea.vmem %s714_s10, 512 }
  0x4e   : > { %512 = vmatpush3.msra.mxu0 %v262_v2  ;;  %v248_v17 = vld [vmem:[%s960_s6 + $0x8] sm:$0xff]  ;;  %v265_v20 = vld [vmem:[#allocation7] sm:$0xff]  ;;  %p716_p8 = scmp.lt.s32.totalorder %s975_s22, %s714_s10  ;;  %p717_p10 = scmp.lt.s32.totalorder %s715_s25, %s709_s21 }
  0x4f   : > { %513 = vmatprep.subr.mxu0 %v261_v3  ;;  %v266_v18 = vld [vmem:[#allocation7 + $0x8] sm:$0xff]  ;;  %p712_p6 = pneg %p711_p4 }
  0x50   : > { %514 = vmatpush3.msra.mxu0 %v261_v3  ;;  %p718_p11 = por %p717_p10, %p716_p8 }
  0x51   : > { %515 = vmatprep.subr.mxu0 %v260_v5 }
  0x52   : > { %516 = vmatpush3.msra.mxu0 %v260_v5  ;;  %p719_p2 = pnand %p718_p11, %p712_p6 }
  0x53   : > { %517 = vmatprep.subr.mxu0 %v259_v6 }
  0x54   : > { %518 = vmatpush3.msra.mxu0 %v259_v6 }
  0x55   : > { %519 = vmatprep.subr.mxu0 %v258_v7 }
  0x56   : > { %520 = vmatpush3.msra.mxu0 %v258_v7 }
  0x57   : > { %521 = vmatprep.subr.mxu0 %v257_v8 }
  0x58   : > { %522 = vmatpush3.msra.mxu0 %v257_v8 }
  0x59   : > { %523 = vmatprep.subr.mxu0 %v256_v9 }
  0x5a   : > { %524 = vmatpush3.msra.mxu0 %v256_v9 }
  0x5b   : > { %525 = vmatprep.subr.mxu0 %v255_v10 }
  0x5c   : > { %526 = vmatpush3.msra.mxu0 %v255_v10 }
  0x5d   : > { %527 = vmatprep.subr.mxu0 %v254_v11 }
  0x5e   : > { %528 = vmatpush3.msra.mxu0 %v254_v11 }
  0x5f   : > { %529 = vmatprep.subr.mxu0 %v253_v12 }
  0x60   : > { %530 = vmatpush3.msra.mxu0 %v253_v12 }
  0x61   : > { %531 = vmatprep.subr.mxu0 %v252_v13 }
  0x62   : > { %532 = vmatpush3.msra.mxu0 %v252_v13 }
  0x63   : > { %533 = vmatprep.subr.mxu0 %v251_v14 }
  0x64   : > { %534 = vmatpush3.msra.mxu0 %v251_v14 }
  0x65   : > { %535 = vmatprep.subr.mxu0 %v250_v15 }
  0x66   : > { %536 = vmatpush3.msra.mxu0 %v250_v15 }
  0x67   : > { %537 = vmatprep.subr.mxu0 %v249_v16 }
  0x68   : > { %538 = vmatpush3.msra.mxu0 %v249_v16 }
  0x69   : > { %540 = vmatmul.mubr.f32.vlgmr.msra.gmra.mxu0 %v248_v17 }
 0x129   : > { %v541_v19 = vpop.f32.mrf.mxu0 }
 0x12a   : > { %v339_v21 = vadd.f32 %v541_v19, %v266_v18 }
 0x12b   : > { %v333_v22 = vpop.f32.mrf.mxu0 }
 0x12c   : > { %343 = vst [vmem:[%s243_s20 + $0x8] sm:$0xff] %v339_v21  ;;  %v334_v23 = vadd.f32 %v333_v22, %v265_v20 }
 0x12e   : > { %342 = vst [vmem:[%s243_s20] sm:$0xff] %v334_v23 }
 0x12f   : > { %722 = shalt.err (!%p719_p2)
}
 0x130   : > { %s723_s18 = scalar_lea.hbm %s980_s8, 256  ;;  %s727_s4 = scalar_lea.hbm %s1031_s3, 512 }
 0x131   : > { %p724_p9 = scmp.ne.s32.totalorder %s980_s8, %s723_s18  ;;  %p728_p0 = scmp.lt.s32.totalorder %s980_s8, %s1031_s3 }
 0x132   : > { %p729_p7 = scmp.lt.s32.totalorder %s727_s4, %s723_s18 }
 0x133   : > { %p725_p12 = pnand %p724_p9, %p924_p3 }
 0x134   : > { %p730_p5 = por %p729_p7, %p728_p0 }
 0x135   : > { %p726_p13 = pneg %p725_p12 }
 0x137   : > { %p731_p1 = pnand %p730_p5, %p726_p13 }
 0x139   : > { %734 = shalt.err (!%p731_p1)
}
 0x13a   : > { %s801_s20 = smov 128   ;;  %s802_s24 = smov 8  }
 0x13b   : > { %552 = dma.vmem_to_hbm [thread:$0]  (%p924_p3), %s975_s22, 256, %s980_s8, %s345_s9, %s801_s20, %s801_s20, %s802_s24  }
 0x13c PF: > { %s375_s5 = sand.u32 1, %s773_s12   ;;  %p1042_p4 = scmp.ne.s32.totalorder %s1036_s23, 0 }
 0x13d   : > { %p1043_p6 = scmp.ge.s32.totalorder %s793_s17, 2  ;;  %s376_s7 = scalar_lea.sflag [#allocation4], %s375_s5 }
 0x13f   : > { %p566_p8 = pnand %p1043_p6, %p1042_p4 }
 0x141   : > { %p567_p10 = pneg %p566_p8 }
 0x143   : > { %768 = dma.done.wait (%p567_p10), %s376_s7, 256  }
 0x144   : > { %770 = vsyncadd (%p567_p10), %s376_s7, 4294967040  ;;  %s20_s17 = sadd.s32 1, %s793_s17   ;;  %s1044_s12 = smov %s777_s13 }
 0x145   : > { %p17_p11 = scmp.ge.s32.totalorder %s20_s17, 4   ;;  %s1045_s13 = smov %s781_s14 }
 0x146   : > { %s1046_s14 = smov %s933_s29  ;;  %s1047_s15 = smov %s789_s16 }
 0x147   : > { %s1048_s16 = smov %s1050_s11  ;;  %19 = sbr.rel (!%p17_p11) target bundleno = 7 (0x7), region = 86 }
 0x14c   :  { %381 = vsyncpa [#allocation3], 1 }
 0x14d   :  { %383 = vsyncpa [#allocation3 + $0x1], 1 }
 0x14e   :  { %384 = vsyncpa [#allocation6], 1 }
 0x14f   :  { %385 = vsyncpa [#allocation4], 1 }
 0x150   :  { %387 = vsyncpa [#allocation4 + $0x1], 1 }

</bundles_post_ra>
